<compile_context>
chip_gen: v7x
topology: tpu7x:2x2x1
jax: 0.10.0
libtpu: 0.0.40
codegen_flags: <defaults>
</compile_context>

<pallas_src>
import jax
import jax.numpy as jnp
from jax.experimental import pallas as pl
from jax.experimental.pallas import tpu as pltpu

N_STATES = 2    # MountainCar observation_space.shape[0]
N_ACTIONS = 3   # MountainCar action_space.n
HIDDEN = 10

LANE = 128        # TPU lane width; batch tiles are multiples of this
MAX_TB = 4096     # batch-tile cap in lanes (sweepable; ~KiB of VMEM per tile)
SMALL_BATCH = 128 # below this, plain XLA beats the pallas_call launch cost


def _round_up(n, m):
    return ((n + m - 1) // m) * m


def _next_pow2(n):
    n = int(n)
    return 1 if n <= 1 else 1 << (n - 1).bit_length()


def _tensorcores_per_device():
    """2 for chips whose 'parallel' grid axes shard across 2 TensorCores
    (v7x, and v4/v5p megacore); 1 for v5e/v6e; 1 as a safe fallback."""
    try:
        kind = jax.devices()[0].device_kind.lower()
    except Exception:
        return 1
    if "7" in kind or "v4" in kind or "v5p" in kind:
        return 2
    return 1


def _choose_tile(batch, n_cores):
    """Lane-tile size: pow2 multiple of 128, capped at MAX_TB, and capped so
    2-TC chips get >= n_cores grid steps once the batch exceeds one lane-group."""
    lanes = _round_up(max(batch, 1), LANE)
    tb = LANE * _next_pow2(lanes // LANE)
    if n_cores > 1 and lanes > LANE:
        per_core = _round_up(-(-lanes // n_cores), LANE)
        tb = min(tb, LANE * _next_pow2(per_core // LANE))
    return min(tb, MAX_TB)


def net_kernel(x_ref, w1_ref, b1_ref, w2_ref, b2_ref, o_ref):
    """Batch-on-lanes forward: x [N_STATES, TB] -> o [N_ACTIONS, TB].

    fc1 and out are unrolled VPU broadcast-FMAs (no MXU); biases are added
    once via the accumulator init; ReLU on the VPU.
    """
    x = x_ref[...]        # [N_STATES, TB]   lane-dense
    w1 = w1_ref[...]      # [HIDDEN, N_STATES]
    w2 = w2_ref[...]      # [N_ACTIONS, HIDDEN]

    # fc1: h = W1 @ x + b1  -- 2-term broadcast FMA, bias folded into init.
    h = w1[:, 0:1] * x[0:1, :] + b1_ref[...]          # [HIDDEN, TB]
    for k in range(1, N_STATES):
        h = h + w1[:, k:k + 1] * x[k:k + 1, :]
    h = jnp.maximum(h, 0.0)                           # ReLU

    # out: y = W2 @ h + b2  -- 10-term unrolled broadcast FMA.
    y = w2[:, 0:1] * h[0:1, :] + b2_ref[...]          # [N_ACTIONS, TB]
    for k in range(1, HIDDEN):
        y = y + w2[:, k:k + 1] * h[k:k + 1, :]

    o_ref[...] = y.astype(o_ref.dtype)


def net_forward_t(x_t, w1, b1, w2, b2):
    """Preferred end-to-end layout: x_t [N_STATES, B] -> [N_ACTIONS, B].
    No wrapper-side padding or transposes; ragged last tile handled by Pallas."""
    B = x_t.shape[1]
    tb = _choose_tile(B, _tensorcores_per_device())
    grid = (pl.cdiv(B, tb),)

    x_t = x_t.astype(jnp.float32)
    w1f = w1.astype(jnp.float32)
    w2f = w2.astype(jnp.float32)
    b1c = b1.astype(jnp.float32).reshape(HIDDEN, 1)
    b2c = b2.astype(jnp.float32).reshape(N_ACTIONS, 1)

    return pl.pallas_call(
        net_kernel,
        out_shape=jax.ShapeDtypeStruct((N_ACTIONS, B), jnp.float32),
        grid=grid,
        in_specs=[
            pl.BlockSpec((N_STATES, tb), lambda i: (0, i)),        # x tile
            pl.BlockSpec((HIDDEN, N_STATES), lambda i: (0, 0)),    # w1 resident
            pl.BlockSpec((HIDDEN, 1), lambda i: (0, 0)),           # b1 resident
            pl.BlockSpec((N_ACTIONS, HIDDEN), lambda i: (0, 0)),   # w2 resident
            pl.BlockSpec((N_ACTIONS, 1), lambda i: (0, 0)),        # b2 resident
        ],
        out_specs=pl.BlockSpec((N_ACTIONS, tb), lambda i: (0, i)),
        compiler_params=pltpu.CompilerParams(
            dimension_semantics=("parallel",)),   # 2-TC chips: shard batch
    )(x_t, w1f, b1c, w2f, b2c)


def net_forward(x, w1, b1, w2, b2):
    """PyTorch-convention wrapper: x [B, N_STATES] -> [B, N_ACTIONS]."""
    B = x.shape[0]
    if B < SMALL_BATCH:
        # Action-selection path (B ~ 1): pallas_call launch + layout cost
        # dwarfs ~800 FLOPs; let XLA fuse the two tiny GEMVs.
        xf = x.astype(jnp.float32)
        h = jnp.maximum(
            jnp.dot(xf, w1.T, precision=jax.lax.Precision.HIGHEST) + b1, 0.0)
        return jnp.dot(h, w2.T, precision=jax.lax.Precision.HIGHEST) + b2
    # Batched replay/eval path.  The transposes here exist only to keep the
    # PyTorch [B, features] API; use net_forward_t end-to-end to avoid them.
    return net_forward_t(x.astype(jnp.float32).T, w1, b1, w2, b2).T


def init_params(key):
    # Mirrors the module's __init__: weights ~ Normal(0, 0.1); small biases.
    k1, k2, k3, k4 = jax.random.split(key, 4)
    w1 = 0.1 * jax.random.normal(k1, (HIDDEN, N_STATES), dtype=jnp.float32)
    b1 = 0.01 * jax.random.normal(k2, (HIDDEN,), dtype=jnp.float32)
    w2 = 0.1 * jax.random.normal(k3, (N_ACTIONS, HIDDEN), dtype=jnp.float32)
    b2 = 0.01 * jax.random.normal(k4, (N_ACTIONS,), dtype=jnp.float32)
    return w1, b1, w2, b2


if __name__ == "__main__":
    key = jax.random.PRNGKey(0)
    kx1, kx2, kx3, kp = jax.random.split(key, 4)
    w1, b1, w2, b2 = init_params(kp)

    def ref(x):
        h = jnp.maximum(
            jnp.dot(x, w1.T, precision=jax.lax.Precision.HIGHEST) + b1, 0.0)
        return jnp.dot(h, w2.T, precision=jax.lax.Precision.HIGHEST) + b2

    # 1) Small batch (action selection) -> plain-XLA dispatch path.
    x_small = jax.random.normal(kx1, (8, N_STATES), dtype=jnp.float32)
    out_small = jax.block_until_ready(net_forward(x_small, w1, b1, w2, b2))
    assert out_small.shape == (8, N_ACTIONS)
    assert jnp.allclose(out_small, ref(x_small), atol=1e-5, rtol=1e-5)

    # 2) Batched replay path -> Pallas kernel, ragged lane tile (no padding).
    x_rep = jax.random.normal(kx2, (300, N_STATES), dtype=jnp.float32)
    out_rep = jax.block_until_ready(net_forward(x_rep, w1, b1, w2, b2))
    assert out_rep.shape == (300, N_ACTIONS)
    assert jnp.allclose(out_rep, ref(x_rep), atol=1e-5, rtol=1e-5)

    # 3) Large batch in the native [features, batch] layout -> multi-step grid.
    x_big_t = jax.random.normal(kx3, (N_STATES, 4500), dtype=jnp.float32)
    out_big_t = jax.block_until_ready(net_forward_t(x_big_t, w1, b1, w2, b2))
    assert out_big_t.shape == (N_ACTIONS, 4500)
    assert jnp.allclose(out_big_t.T, ref(x_big_t.T), atol=1e-5, rtol=1e-5)

    print("KERNEL_OK")
</pallas_src>

<mosaic_0001>
module attributes {stable_mosaic.version = 11 : i64} {
  func.func @net_kernel(%arg0: i32, %arg1: memref<2x512xf32, #tpu.memory_space<vmem>>, %arg2: memref<10x2xf32, #tpu.memory_space<vmem>>, %arg3: memref<10x1xf32, #tpu.memory_space<vmem>>, %arg4: memref<3x10xf32, #tpu.memory_space<vmem>>, %arg5: memref<3x1xf32, #tpu.memory_space<vmem>>, %arg6: memref<3x512xf32, #tpu.memory_space<vmem>>) attributes {dimension_semantics = [#tpu.dimension_semantics<parallel>], iteration_bounds = array<i64: 1>, scalar_prefetch = 0 : i64, scratch_operands = 0 : i64, tpu.core_type = #tpu.core_type<tc>, window_params = [{transform_indices = @transform_0, window_bounds = array<i64: 2, 512>}, {pipeline_mode = #tpu.pipeline_mode<synchronous>, transform_indices = @transform_1, window_bounds = array<i64: 10, 2>}, {pipeline_mode = #tpu.pipeline_mode<synchronous>, transform_indices = @transform_2, window_bounds = array<i64: 10, 1>}, {pipeline_mode = #tpu.pipeline_mode<synchronous>, transform_indices = @transform_3, window_bounds = array<i64: 3, 10>}, {pipeline_mode = #tpu.pipeline_mode<synchronous>, transform_indices = @transform_4, window_bounds = array<i64: 3, 1>}, {transform_indices = @transform_5, window_bounds = array<i64: 3, 512>}]} {
    %c0 = arith.constant 0 : index
    %c0_0 = arith.constant 0 : index
    %0 = vector.load %arg1[%c0, %c0_0] : memref<2x512xf32, #tpu.memory_space<vmem>>, vector<2x512xf32>
    %c0_1 = arith.constant 0 : index
    %c0_2 = arith.constant 0 : index
    %1 = vector.load %arg2[%c0_1, %c0_2] : memref<10x2xf32, #tpu.memory_space<vmem>>, vector<10x2xf32>
    %c0_3 = arith.constant 0 : index
    %c0_4 = arith.constant 0 : index
    %2 = vector.load %arg4[%c0_3, %c0_4] : memref<3x10xf32, #tpu.memory_space<vmem>>, vector<3x10xf32>
    %3 = vector.extract_strided_slice %1 {offsets = [0, 0], sizes = [10, 1], strides = [1, 1]} : vector<10x2xf32> to vector<10x1xf32>
    %4 = vector.extract_strided_slice %0 {offsets = [0, 0], sizes = [1, 512], strides = [1, 1]} : vector<2x512xf32> to vector<1x512xf32>
    %5 = vector.broadcast %3 : vector<10x1xf32> to vector<10x512xf32>
    %6 = vector.broadcast %4 : vector<1x512xf32> to vector<10x512xf32>
    %7 = arith.mulf %5, %6 : vector<10x512xf32>
    %c0_5 = arith.constant 0 : index
    %c0_6 = arith.constant 0 : index
    %8 = vector.load %arg3[%c0_5, %c0_6] : memref<10x1xf32, #tpu.memory_space<vmem>>, vector<10x1xf32>
    %9 = vector.broadcast %8 : vector<10x1xf32> to vector<10x512xf32>
    %10 = arith.addf %7, %9 : vector<10x512xf32>
    %11 = vector.extract_strided_slice %1 {offsets = [0, 1], sizes = [10, 1], strides = [1, 1]} : vector<10x2xf32> to vector<10x1xf32>
    %12 = vector.extract_strided_slice %0 {offsets = [1, 0], sizes = [1, 512], strides = [1, 1]} : vector<2x512xf32> to vector<1x512xf32>
    %13 = vector.broadcast %11 : vector<10x1xf32> to vector<10x512xf32>
    %14 = vector.broadcast %12 : vector<1x512xf32> to vector<10x512xf32>
    %15 = arith.mulf %13, %14 : vector<10x512xf32>
    %16 = arith.addf %10, %15 : vector<10x512xf32>
    %cst = arith.constant 0.000000e+00 : f32
    %17 = vector.broadcast %cst : f32 to vector<10x512xf32>
    %18 = arith.maximumf %16, %17 : vector<10x512xf32>
    %19 = vector.extract_strided_slice %2 {offsets = [0, 0], sizes = [3, 1], strides = [1, 1]} : vector<3x10xf32> to vector<3x1xf32>
    %20 = vector.extract_strided_slice %18 {offsets = [0, 0], sizes = [1, 512], strides = [1, 1]} : vector<10x512xf32> to vector<1x512xf32>
    %21 = vector.broadcast %19 : vector<3x1xf32> to vector<3x512xf32>
    %22 = vector.broadcast %20 : vector<1x512xf32> to vector<3x512xf32>
    %23 = arith.mulf %21, %22 : vector<3x512xf32>
    %c0_7 = arith.constant 0 : index
    %c0_8 = arith.constant 0 : index
    %24 = vector.load %arg5[%c0_7, %c0_8] : memref<3x1xf32, #tpu.memory_space<vmem>>, vector<3x1xf32>
    %25 = vector.broadcast %24 : vector<3x1xf32> to vector<3x512xf32>
    %26 = arith.addf %23, %25 : vector<3x512xf32>
    %27 = vector.extract_strided_slice %2 {offsets = [0, 1], sizes = [3, 1], strides = [1, 1]} : vector<3x10xf32> to vector<3x1xf32>
    %28 = vector.extract_strided_slice %18 {offsets = [1, 0], sizes = [1, 512], strides = [1, 1]} : vector<10x512xf32> to vector<1x512xf32>
    %29 = vector.broadcast %27 : vector<3x1xf32> to vector<3x512xf32>
    %30 = vector.broadcast %28 : vector<1x512xf32> to vector<3x512xf32>
    %31 = arith.mulf %29, %30 : vector<3x512xf32>
    %32 = arith.addf %26, %31 : vector<3x512xf32>
    %33 = vector.extract_strided_slice %2 {offsets = [0, 2], sizes = [3, 1], strides = [1, 1]} : vector<3x10xf32> to vector<3x1xf32>
    %34 = vector.extract_strided_slice %18 {offsets = [2, 0], sizes = [1, 512], strides = [1, 1]} : vector<10x512xf32> to vector<1x512xf32>
    %35 = vector.broadcast %33 : vector<3x1xf32> to vector<3x512xf32>
    %36 = vector.broadcast %34 : vector<1x512xf32> to vector<3x512xf32>
    %37 = arith.mulf %35, %36 : vector<3x512xf32>
    %38 = arith.addf %32, %37 : vector<3x512xf32>
    %39 = vector.extract_strided_slice %2 {offsets = [0, 3], sizes = [3, 1], strides = [1, 1]} : vector<3x10xf32> to vector<3x1xf32>
    %40 = vector.extract_strided_slice %18 {offsets = [3, 0], sizes = [1, 512], strides = [1, 1]} : vector<10x512xf32> to vector<1x512xf32>
    %41 = vector.broadcast %39 : vector<3x1xf32> to vector<3x512xf32>
    %42 = vector.broadcast %40 : vector<1x512xf32> to vector<3x512xf32>
    %43 = arith.mulf %41, %42 : vector<3x512xf32>
    %44 = arith.addf %38, %43 : vector<3x512xf32>
    %45 = vector.extract_strided_slice %2 {offsets = [0, 4], sizes = [3, 1], strides = [1, 1]} : vector<3x10xf32> to vector<3x1xf32>
    %46 = vector.extract_strided_slice %18 {offsets = [4, 0], sizes = [1, 512], strides = [1, 1]} : vector<10x512xf32> to vector<1x512xf32>
    %47 = vector.broadcast %45 : vector<3x1xf32> to vector<3x512xf32>
    %48 = vector.broadcast %46 : vector<1x512xf32> to vector<3x512xf32>
    %49 = arith.mulf %47, %48 : vector<3x512xf32>
    %50 = arith.addf %44, %49 : vector<3x512xf32>
    %51 = vector.extract_strided_slice %2 {offsets = [0, 5], sizes = [3, 1], strides = [1, 1]} : vector<3x10xf32> to vector<3x1xf32>
    %52 = vector.extract_strided_slice %18 {offsets = [5, 0], sizes = [1, 512], strides = [1, 1]} : vector<10x512xf32> to vector<1x512xf32>
    %53 = vector.broadcast %51 : vector<3x1xf32> to vector<3x512xf32>
    %54 = vector.broadcast %52 : vector<1x512xf32> to vector<3x512xf32>
    %55 = arith.mulf %53, %54 : vector<3x512xf32>
    %56 = arith.addf %50, %55 : vector<3x512xf32>
    %57 = vector.extract_strided_slice %2 {offsets = [0, 6], sizes = [3, 1], strides = [1, 1]} : vector<3x10xf32> to vector<3x1xf32>
    %58 = vector.extract_strided_slice %18 {offsets = [6, 0], sizes = [1, 512], strides = [1, 1]} : vector<10x512xf32> to vector<1x512xf32>
    %59 = vector.broadcast %57 : vector<3x1xf32> to vector<3x512xf32>
    %60 = vector.broadcast %58 : vector<1x512xf32> to vector<3x512xf32>
    %61 = arith.mulf %59, %60 : vector<3x512xf32>
    %62 = arith.addf %56, %61 : vector<3x512xf32>
    %63 = vector.extract_strided_slice %2 {offsets = [0, 7], sizes = [3, 1], strides = [1, 1]} : vector<3x10xf32> to vector<3x1xf32>
    %64 = vector.extract_strided_slice %18 {offsets = [7, 0], sizes = [1, 512], strides = [1, 1]} : vector<10x512xf32> to vector<1x512xf32>
    %65 = vector.broadcast %63 : vector<3x1xf32> to vector<3x512xf32>
    %66 = vector.broadcast %64 : vector<1x512xf32> to vector<3x512xf32>
    %67 = arith.mulf %65, %66 : vector<3x512xf32>
    %68 = arith.addf %62, %67 : vector<3x512xf32>
    %69 = vector.extract_strided_slice %2 {offsets = [0, 8], sizes = [3, 1], strides = [1, 1]} : vector<3x10xf32> to vector<3x1xf32>
    %70 = vector.extract_strided_slice %18 {offsets = [8, 0], sizes = [1, 512], strides = [1, 1]} : vector<10x512xf32> to vector<1x512xf32>
    %71 = vector.broadcast %69 : vector<3x1xf32> to vector<3x512xf32>
    %72 = vector.broadcast %70 : vector<1x512xf32> to vector<3x512xf32>
    %73 = arith.mulf %71, %72 : vector<3x512xf32>
    %74 = arith.addf %68, %73 : vector<3x512xf32>
    %75 = vector.extract_strided_slice %2 {offsets = [0, 9], sizes = [3, 1], strides = [1, 1]} : vector<3x10xf32> to vector<3x1xf32>
    %76 = vector.extract_strided_slice %18 {offsets = [9, 0], sizes = [1, 512], strides = [1, 1]} : vector<10x512xf32> to vector<1x512xf32>
    %77 = vector.broadcast %75 : vector<3x1xf32> to vector<3x512xf32>
    %78 = vector.broadcast %76 : vector<1x512xf32> to vector<3x512xf32>
    %79 = arith.mulf %77, %78 : vector<3x512xf32>
    %80 = arith.addf %74, %79 : vector<3x512xf32>
    %c0_9 = arith.constant 0 : index
    %c0_10 = arith.constant 0 : index
    %81 = vector.load %arg6[%c0_9, %c0_10] : memref<3x512xf32, #tpu.memory_space<vmem>>, vector<3x512xf32>
    tpu.vector_store %arg6[%c0_9, %c0_10], %80 {strides = array<i32>} : memref<3x512xf32, #tpu.memory_space<vmem>>, vector<3x512xf32>,
    return
  }
  func.func @transform_0(%arg0: i32) -> (i32, i32) {
    %c0_i32 = arith.constant 0 : i32
    %c0_i32_0 = arith.constant 0 : i32
    return %c0_i32, %arg0 : i32, i32
  }
  func.func @transform_1(%arg0: i32) -> (i32, i32) {
    %c0_i32 = arith.constant 0 : i32
    %c0_i32_0 = arith.constant 0 : i32
    %c0_i32_1 = arith.constant 0 : i32
    return %c0_i32, %c0_i32_0 : i32, i32
  }
  func.func @transform_2(%arg0: i32) -> (i32, i32) {
    %c0_i32 = arith.constant 0 : i32
    %c0_i32_0 = arith.constant 0 : i32
    %c0_i32_1 = arith.constant 0 : i32
    return %c0_i32, %c0_i32_0 : i32, i32
  }
  func.func @transform_3(%arg0: i32) -> (i32, i32) {
    %c0_i32 = arith.constant 0 : i32
    %c0_i32_0 = arith.constant 0 : i32
    %c0_i32_1 = arith.constant 0 : i32
    return %c0_i32, %c0_i32_0 : i32, i32
  }
  func.func @transform_4(%arg0: i32) -> (i32, i32) {
    %c0_i32 = arith.constant 0 : i32
    %c0_i32_0 = arith.constant 0 : i32
    %c0_i32_1 = arith.constant 0 : i32
    return %c0_i32, %c0_i32_0 : i32, i32
  }
  func.func @transform_5(%arg0: i32) -> (i32, i32) {
    %c0_i32 = arith.constant 0 : i32
    %c0_i32_0 = arith.constant 0 : i32
    return %c0_i32, %arg0 : i32, i32
  }
}

</mosaic_0001>

<bundles_post_ra>
// kernel: tpu_custom_call.1
= control target key start
LH: loop header
LB: loop body
LE: loop exit
PB: predicated region body
PF: predicated region fallthrough
CT: control target
= control target key end

     0   :  { %v529_v2 = vmov 2   ;;  %v530_v3 = vmov 1   ;;  %s737_s0 = inlined_call_operand.vmem [shape: f32[2,300], index: 0, kind: input, shape index: {}]   ;;  %s738_s1 = inlined_call_operand.vmem [shape: f32[10,2], index: 1, kind: input, shape index: {}]   ;;  %s739_s2 = inlined_call_operand.vmem [shape: f32[10,1], index: 2, kind: input, shape index: {}]   ;;  %s740_s3 = inlined_call_operand.vmem [shape: f32[3,10], index: 3, kind: input, shape index: {}]   ;;  %s741_s4 = inlined_call_operand.vmem [shape: f32[3,1], index: 4, kind: input, shape index: {}]   ;;  %s742_s5 = inlined_call_operand.hbm [shape: f32[3,300], index: 5, kind: output, shape index: {}]  }
   0x1   :  { %v24_v0 = vld [vmem:[%s740_s3] sm:$0x7]  ;;  %493 = vset.pattern.permute.xlu0 %v529_v2  ;;  %490 = vset.pattern.permute.xlu1 %v530_v3 }
   0x2   :  { %v22_v1 = vld [vmem:[%s738_s1] sm:$0xff]  ;;  %232 = vperm.xlu0 %493, %v24_v0  }
   0x3   :  { %101 = vperm.xlu1 %490, %v22_v1  }
   0x4   :  { %10 = vsyncpa [#allocation3], 0  ;;  %v531_v4 = vmov 0   ;;  %v80_v5 = vld [vmem:[%s739_s2] sm:$0xff]  ;;  %v23_v7 = vld [vmem:[%s738_s1 + $0x8] sm:$0x3]  ;;  %v36_v16 = vlaneseq }
   0x5   :  { %v193_v6 = vld [vmem:[%s741_s4] sm:$0x7]  ;;  %v81_v8 = vld [vmem:[%s739_s2 + $0x8] sm:$0x3]  ;;  %v532_v9 = vmov 3   ;;  %v533_v10 = vmov 5  }
   0x6   :  { %494 = vset.pattern.permute.xlu0 %v531_v4  ;;  %v534_v11 = vmov 8   ;;  %v535_v12 = vmov 4   ;;  %v536_v13 = vmov 9   ;;  %v537_v14 = vmov 6   ;;  %v21_v26 = vld [vmem:[%s737_s0] sm:$0xff] }
   0x7   :  { %491 = vset.pattern.permute.xlu1 %v531_v4  ;;  %27 = vperm.xlu0 %494, %v22_v1   ;;  %v538_v15 = vmov 7   ;;  %v37_v17 = vshrl.u32 %v36_v16, 7 }
   0x8   :  { %170 = vperm.xlu1 %491, %v24_v0  }
   0x9   :  { %v588_v18 = vsub.s32 0, %v37_v17  ;;  %v590_v19 = vsub.s32 2, %v37_v17  ;;  %v592_v20 = vsub.s32 4, %v37_v17  ;;  %v594_v21 = vsub.s32 6, %v37_v17 }
   0xa   :  { %v596_v22 = vsub.s32 1, %v37_v17  ;;  %v598_v23 = vsub.s32 3, %v37_v17  ;;  %v600_v24 = vsub.s32 5, %v37_v17  ;;  %v602_v25 = vsub.s32 7, %v37_v17 }
   0xb   :  { %84 = vperm.xlu0 %494, %v80_v5   ;;  %v39_v27 = vrot.slane %v21_v26, %v588_v18  ;;  %v43_v28 = vrot.slane %v21_v26, %v590_v19  ;;  %v47_v29 = vrot.slane %v21_v26, %v592_v20  ;;  %v51_v30 = vrot.slane %v21_v26, %v594_v21 }
   0xc   :  { %492 = vset.pattern.permute.xlu1 %v530_v3  ;;  %v111_v33 = vrot.slane %v21_v26, %v596_v22  ;;  %v115_v34 = vrot.slane %v21_v26, %v598_v23  ;;  %v119_v35 = vrot.slane %v21_v26, %v600_v24  ;;  %v123_v36 = vrot.slane %v21_v26, %v602_v25 }
   0xd   :  { %204 = vperm.xlu1 %492, %v24_v0   ;;  %v59_v37 = vrot.slane %v39_v27, %v588_v18  ;;  %v63_v38 = vrot.slane %v43_v28, %v588_v18  ;;  %v67_v39 = vrot.slane %v47_v29, %v588_v18  ;;  %v71_v40 = vrot.slane %v51_v30, %v588_v18 }
   0xe   :  { %v622_v41 = vrot.slane %v111_v33, %v596_v22  ;;  %v625_v42 = vrot.slane %v115_v34, %v596_v22  ;;  %v628_v43 = vrot.slane %v119_v35, %v596_v22  ;;  %v631_v44 = vrot.slane %v123_v36, %v596_v22 }
   0xf   :  { %196 = vperm.xlu0 %494, %v193_v6  }
  0x11   :  { %495 = vset.pattern.permute.xlu1 %v531_v4 }
  0x12   :  { %32 = vperm.xlu1 %495, %v23_v7  }
  0x13   :  { %89 = vperm.xlu0 %494, %v81_v8  }
  0x16   :  { %496 = vset.pattern.permute.xlu1 %v532_v9 }
  0x17   :  { %260 = vperm.xlu1 %496, %v24_v0   ;;  %499 = vset.pattern.permute.xlu0 %v533_v10 }
  0x18   :  { %316 = vperm.xlu0 %499, %v24_v0  }
  0x1b   :  { %497 = vset.pattern.permute.xlu1 %v530_v3 }
  0x1c   :  { %105 = vperm.xlu1 %497, %v23_v7   ;;  %502 = vset.pattern.permute.xlu0 %v534_v11 }
  0x1d   :  { %400 = vperm.xlu0 %502, %v24_v0  }
  0x20   :  { %498 = vset.pattern.permute.xlu1 %v535_v12 }
  0x21   :  { %288 = vperm.xlu1 %498, %v24_v0   ;;  %504 = vset.pattern.permute.xlu0 %v536_v13 }
  0x25   :  { %500 = vset.pattern.permute.xlu1 %v537_v14 }
  0x26   :  { %344 = vperm.xlu1 %500, %v24_v0  }
  0x2a   :  { %501 = vset.pattern.permute.xlu1 %v538_v15 }
  0x2b   :  { %372 = vperm.xlu1 %501, %v24_v0  }
  0x2f   :  { %503 = vset.pattern.permute.xlu1 %v536_v13 }
  0x30   :  { %428 = vperm.xlu1 %503, %v24_v0  }
  0x81   :  { %v611_v32 = vpop.permute.xlu0 %232 }
  0x82   :  { %v102_v31 = vpop.permute.xlu1 %101 }
  0x83   :  { %v144_v51 = vmul.f32 %v622_v41, %v102_v31  ;;  %v145_v52 = vmul.f32 %v625_v42, %v102_v31  ;;  %v146_v53 = vmul.f32 %v628_v43, %v102_v31  ;;  %v147_v54 = vmul.f32 %v631_v44, %v102_v31 }
  0x86   :  { %v28_v45 = vpop.permute.xlu0 %27 }
  0x87   :  { %v171_v46 = vpop.permute.xlu1 %170  ;;  %v72_v47 = vmul.f32 %v59_v37, %v28_v45  ;;  %v73_v48 = vmul.f32 %v63_v38, %v28_v45  ;;  %v74_v49 = vmul.f32 %v67_v39, %v28_v45  ;;  %v75_v50 = vmul.f32 %v71_v40, %v28_v45 }
  0x8a   :  { %v85_v55 = vpop.permute.xlu0 %84 }
  0x8b   :  { %v92_v56 = vadd.f32 %v85_v55, %v72_v47  ;;  %v93_v57 = vadd.f32 %v85_v55, %v73_v48  ;;  %v94_v58 = vadd.f32 %v85_v55, %v74_v49  ;;  %v95_v59 = vadd.f32 %v85_v55, %v75_v50 }
  0x8c   :  { %v205_v60 = vpop.permute.xlu1 %204 }
  0x8d   :  { %v152_v61 = vadd.f32 %v144_v51, %v92_v56  ;;  %v153_v62 = vadd.f32 %v145_v52, %v93_v57  ;;  %v154_v63 = vadd.f32 %v146_v53, %v94_v58  ;;  %v155_v0 = vadd.f32 %v147_v54, %v95_v59 }
  0x8e   :  { %v197_v1 = vpop.permute.xlu0 %196 }
  0x8f   :  { %v637_v2 = vmax.f32 %v152_v61, 0.0  ;;  %v639_v3 = vmax.f32 %v153_v62, 0.0  ;;  %v641_v4 = vmax.f32 %v154_v63, 0.0  ;;  %v643_v5 = vmax.f32 %v155_v0, 0.0 }
  0x91   :  { %v33_v6 = vpop.permute.xlu1 %32  ;;  %v210_v7 = vrot.slane %v637_v2, %v596_v22  ;;  %v214_v8 = vrot.slane %v639_v3, %v596_v22  ;;  %v218_v9 = vrot.slane %v641_v4, %v596_v22  ;;  %v222_v10 = vrot.slane %v643_v5, %v596_v22 }
  0x92   :  { %v176_v11 = vrot.slane %v637_v2, %v588_v18  ;;  %v180_v12 = vrot.slane %v639_v3, %v588_v18  ;;  %v184_v13 = vrot.slane %v641_v4, %v588_v18  ;;  %v188_v14 = vrot.slane %v643_v5, %v588_v18  ;;  %v90_v31 = vpop.permute.xlu0 %89 }
  0x93   :  { %v223_v15 = vmul.f32 %v210_v7, %v205_v60  ;;  %v224_v16 = vmul.f32 %v214_v8, %v205_v60  ;;  %v225_v17 = vmul.f32 %v218_v9, %v205_v60  ;;  %v226_v26 = vmul.f32 %v222_v10, %v205_v60 }
  0x94   :  { %v189_v27 = vmul.f32 %v176_v11, %v171_v46  ;;  %v190_v28 = vmul.f32 %v180_v12, %v171_v46  ;;  %v191_v29 = vmul.f32 %v184_v13, %v171_v46  ;;  %v192_v30 = vmul.f32 %v188_v14, %v171_v46 }
  0x95   :  { %v76_v33 = vmul.f32 %v59_v37, %v33_v6  ;;  %v77_v34 = vmul.f32 %v63_v38, %v33_v6  ;;  %v78_v35 = vmul.f32 %v67_v39, %v33_v6  ;;  %v79_v36 = vmul.f32 %v71_v40, %v33_v6 }
  0x96   :  { %v261_v45 = vpop.permute.xlu1 %260  ;;  %v199_v47 = vadd.f32 %v197_v1, %v189_v27  ;;  %v200_v48 = vadd.f32 %v197_v1, %v190_v28  ;;  %v201_v49 = vadd.f32 %v197_v1, %v191_v29  ;;  %v202_v50 = vadd.f32 %v197_v1, %v192_v30 }
  0x97   :  { %v96_v51 = vadd.f32 %v90_v31, %v76_v33  ;;  %v97_v52 = vadd.f32 %v90_v31, %v77_v34  ;;  %v98_v53 = vadd.f32 %v90_v31, %v78_v35  ;;  %v99_v54 = vadd.f32 %v90_v31, %v79_v36  ;;  %v317_v14 = vpop.permute.xlu0 %316 }
  0x98   :  { %v227_v55 = vadd.f32 %v223_v15, %v199_v47  ;;  %v228_v56 = vadd.f32 %v224_v16, %v200_v48  ;;  %v229_v57 = vadd.f32 %v225_v17, %v201_v49  ;;  %v230_v58 = vadd.f32 %v226_v26, %v202_v50 }
  0x99   :  { %v238_v46 = vrot.slane %v637_v2, %v590_v19  ;;  %v242_v37 = vrot.slane %v639_v3, %v590_v19  ;;  %v246_v38 = vrot.slane %v641_v4, %v590_v19  ;;  %v250_v39 = vrot.slane %v643_v5, %v590_v19 }
  0x9a   :  { %v266_v40 = vrot.slane %v637_v2, %v598_v23  ;;  %v270_v59 = vrot.slane %v639_v3, %v598_v23  ;;  %v274_v60 = vrot.slane %v641_v4, %v598_v23  ;;  %v278_v61 = vrot.slane %v643_v5, %v598_v23 }
  0x9b   :  { %v106_v62 = vpop.permute.xlu1 %105  ;;  %v251_v63 = vmul.f32 %v238_v46, %v611_v32  ;;  %v252_v0 = vmul.f32 %v242_v37, %v611_v32  ;;  %v253_v1 = vmul.f32 %v246_v38, %v611_v32  ;;  %v254_v19 = vmul.f32 %v250_v39, %v611_v32 }
  0x9c   :  { %v279_v6 = vmul.f32 %v266_v40, %v261_v45  ;;  %v280_v7 = vmul.f32 %v270_v59, %v261_v45  ;;  %v281_v8 = vmul.f32 %v274_v60, %v261_v45  ;;  %v282_v9 = vmul.f32 %v278_v61, %v261_v45 }
  0x9d   :  { %v255_v10 = vadd.f32 %v251_v63, %v227_v55  ;;  %v256_v11 = vadd.f32 %v252_v0, %v228_v56  ;;  %v257_v12 = vadd.f32 %v253_v1, %v229_v57  ;;  %v258_v13 = vadd.f32 %v254_v19, %v230_v58  ;;  %v401_v63 = vpop.permute.xlu0 %400 }
  0x9e   :  { %v322_v23 = vrot.slane %v637_v2, %v600_v24  ;;  %v326_v15 = vrot.slane %v639_v3, %v600_v24  ;;  %v330_v16 = vrot.slane %v641_v4, %v600_v24  ;;  %v334_v32 = vrot.slane %v643_v5, %v600_v24 }
  0x9f   :  { %v283_v17 = vadd.f32 %v279_v6, %v255_v10  ;;  %v284_v26 = vadd.f32 %v280_v7, %v256_v11  ;;  %v285_v27 = vadd.f32 %v281_v8, %v257_v12  ;;  %v286_v28 = vadd.f32 %v282_v9, %v258_v13 }
  0xa0   :  { %v289_v29 = vpop.permute.xlu1 %288  ;;  %v335_v30 = vmul.f32 %v322_v23, %v317_v14  ;;  %v336_v31 = vmul.f32 %v326_v15, %v317_v14  ;;  %v337_v33 = vmul.f32 %v330_v16, %v317_v14  ;;  %v338_v34 = vmul.f32 %v334_v32, %v317_v14 }
  0xa1   :  { %v148_v35 = vmul.f32 %v622_v41, %v106_v62  ;;  %v149_v36 = vmul.f32 %v625_v42, %v106_v62  ;;  %v150_v45 = vmul.f32 %v628_v43, %v106_v62  ;;  %v151_v47 = vmul.f32 %v631_v44, %v106_v62 }
  0xa2   :  { %v294_v24 = vrot.slane %v637_v2, %v592_v20  ;;  %v298_v48 = vrot.slane %v639_v3, %v592_v20  ;;  %v302_v49 = vrot.slane %v641_v4, %v592_v20  ;;  %v306_v50 = vrot.slane %v643_v5, %v592_v20 }
  0xa3   :  { %v156_v55 = vadd.f32 %v148_v35, %v96_v51  ;;  %v157_v41 = vadd.f32 %v149_v36, %v97_v52  ;;  %v158_v56 = vadd.f32 %v150_v45, %v98_v53  ;;  %v159_v42 = vadd.f32 %v151_v47, %v99_v54 }
  0xa4   :  { %v307_v57 = vmul.f32 %v294_v24, %v289_v29  ;;  %v308_v43 = vmul.f32 %v298_v48, %v289_v29  ;;  %v309_v58 = vmul.f32 %v302_v49, %v289_v29  ;;  %v310_v44 = vmul.f32 %v306_v50, %v289_v29 }
  0xa5   :  { %v345_v46 = vpop.permute.xlu1 %344  ;;  %v164_v37 = vmax.f32 %v156_v55, 0.0  ;;  %v165_v38 = vmax.f32 %v157_v41, 0.0  ;;  %v166_v39 = vmax.f32 %v158_v56, 0.0  ;;  %v167_v40 = vmax.f32 %v159_v42, 0.0 }
  0xa6   :  { %v311_v59 = vadd.f32 %v307_v57, %v283_v17  ;;  %v312_v60 = vadd.f32 %v308_v43, %v284_v26  ;;  %v313_v61 = vadd.f32 %v309_v58, %v285_v27  ;;  %v314_v62 = vadd.f32 %v310_v44, %v286_v28 }
  0xa7   :  { %v406_v20 = vrot.slane %v164_v37, %v588_v18  ;;  %v410_v51 = vrot.slane %v165_v38, %v588_v18  ;;  %v414_v52 = vrot.slane %v166_v39, %v588_v18  ;;  %v418_v53 = vrot.slane %v167_v40, %v588_v18 }
  0xa8   :  { %v339_v54 = vadd.f32 %v335_v30, %v311_v59  ;;  %v340_v0 = vadd.f32 %v336_v31, %v312_v60  ;;  %v341_v1 = vadd.f32 %v337_v33, %v313_v61  ;;  %v342_v19 = vadd.f32 %v338_v34, %v314_v62 }
  0xa9   :  { %v419_v6 = vmul.f32 %v406_v20, %v401_v63  ;;  %v420_v7 = vmul.f32 %v410_v51, %v401_v63  ;;  %v421_v8 = vmul.f32 %v414_v52, %v401_v63  ;;  %v422_v9 = vmul.f32 %v418_v53, %v401_v63 }
  0xaa   :  { %v373_v10 = vpop.permute.xlu1 %372  ;;  %v350_v11 = vrot.slane %v637_v2, %v594_v21  ;;  %v354_v12 = vrot.slane %v639_v3, %v594_v21  ;;  %v358_v13 = vrot.slane %v641_v4, %v594_v21  ;;  %v362_v18 = vrot.slane %v643_v5, %v594_v21 }
  0xab   :  { %v378_v14 = vrot.slane %v637_v2, %v602_v25  ;;  %v382_v23 = vrot.slane %v639_v3, %v602_v25  ;;  %v386_v15 = vrot.slane %v641_v4, %v602_v25  ;;  %v390_v16 = vrot.slane %v643_v5, %v602_v25 }
  0xac   :  { %v363_v32 = vmul.f32 %v350_v11, %v345_v46  ;;  %v364_v17 = vmul.f32 %v354_v12, %v345_v46  ;;  %v365_v26 = vmul.f32 %v358_v13, %v345_v46  ;;  %v366_v27 = vmul.f32 %v362_v18, %v345_v46 }
  0xad   :  { %v391_v28 = vmul.f32 %v378_v14, %v373_v10  ;;  %v392_v29 = vmul.f32 %v382_v23, %v373_v10  ;;  %v393_v30 = vmul.f32 %v386_v15, %v373_v10  ;;  %v394_v21 = vmul.f32 %v390_v16, %v373_v10 }
  0xae   :  { %v367_v31 = vadd.f32 %v363_v32, %v339_v54  ;;  %v368_v33 = vadd.f32 %v364_v17, %v340_v0  ;;  %v369_v2 = vadd.f32 %v365_v26, %v341_v1  ;;  %v370_v34 = vadd.f32 %v366_v27, %v342_v19 }
  0xaf   :  { %v429_v35 = vpop.permute.xlu1 %428  ;;  %v434_v3 = vrot.slane %v164_v37, %v596_v22  ;;  %v438_v4 = vrot.slane %v165_v38, %v596_v22  ;;  %v442_v36 = vrot.slane %v166_v39, %v596_v22  ;;  %v446_v25 = vrot.slane %v167_v40, %v596_v22 }
  0xb0   :  { %v395_v5 = vadd.f32 %v391_v28, %v367_v31  ;;  %v396_v45 = vadd.f32 %v392_v29, %v368_v33  ;;  %v397_v47 = vadd.f32 %v393_v30, %v369_v2  ;;  %v398_v24 = vadd.f32 %v394_v21, %v370_v34 }
  0xb1   :  { %v447_v48 = vmul.f32 %v434_v3, %v429_v35  ;;  %v448_v49 = vmul.f32 %v438_v4, %v429_v35  ;;  %v449_v50 = vmul.f32 %v442_v36, %v429_v35  ;;  %v450_v55 = vmul.f32 %v446_v25, %v429_v35 }
  0xb2   :  { %v423_v41 = vadd.f32 %v419_v6, %v395_v5  ;;  %v424_v56 = vadd.f32 %v420_v7, %v396_v45  ;;  %v425_v42 = vadd.f32 %v421_v8, %v397_v47  ;;  %v426_v57 = vadd.f32 %v422_v9, %v398_v24 }
  0xb4   :  { %v451_v43 = vadd.f32 %v447_v48, %v423_v41  ;;  %v452_v58 = vadd.f32 %v448_v49, %v424_v56  ;;  %v453_v44 = vadd.f32 %v449_v50, %v425_v42  ;;  %v454_v46 = vadd.f32 %v450_v55, %v426_v57 }
  0xb6   :  { %v459_v37 = vcombine.low %v451_v43, %v452_v58  ;;  %v460_v38 = vcombine.low %v453_v44, %v454_v46 }
  0xb8   :  { %463 = vst [vmem:[#allocation2] sm:$0x77] %v459_v37  ;;  %464 = vst [vmem:[#allocation2 + $0x8] sm:$0x77] %v460_v38 }
  0xb9   :  { %469 = vsyncadd [#allocation3], 64  ;;  %s539_s0 = smov [#allocation2]  }
  0xba   :  { %s471_s4 = sshll.u32 %s539_s0, 4  ;;  %s472_s4 = int_to_ptr.vmem [resolvable:$true] %s471_s4 }
  0xbb   :  { %s505_s29 = scalar_lea.vmem %s472_s4, 192  ;;  %s509_s30 = scalar_lea.vmem %s472_s4, 256 }
  0xbc   :  { %p506_p0 = scmp.ne.s32.totalorder %s472_s4, %s505_s29  ;;  %p510_p1 = scmp.lt.s32.totalorder %s472_s4, %s472_s4 }
  0xbd   :  { %p511_p2 = scmp.lt.s32.totalorder %s509_s30, %s505_s29 }
  0xbf   :  { %p512_p3 = por %p511_p2, %p510_p1 }
  0xc1   :  { %p513_p4 = pnand %p512_p3, %p506_p0 }
  0xc3   :  { %516 = shalt.err (!%p513_p4)
}
  0xc4   :  { %s517_s8 = scalar_lea.hbm %s742_s5, 192 }
  0xc5   :  { %p518_p5 = scmp.ne.s32.totalorder %s742_s5, %s517_s8  ;;  %p521_p6 = scmp.lt.u32.totalorder %s517_s8, %s742_s5 }
  0xc7   :  { %p523_p7 = pnand %p521_p6, %p518_p5 }
  0xc9   :  { %526 = shalt.err (!%p523_p7)
}
  0xca   :  { %474 = dma.vmem_to_hbm [thread:$0]  %s472_s4, 192, %s742_s5, [#allocation3]  }
  0xcb   :  { %527 = dma.done.wait [#allocation3], 256  }
  0xcc   :  { %528 = vsyncadd [#allocation3], 4294967040 }
  0xcd   :  { %478 = vsyncpa [#allocation3], 1 }

</bundles_post_ra>
